<compile_context>
chip_gen: v7x
topology: tpu7x:2x2x1
jax: 0.10.0
libtpu: 0.0.40
codegen_flags: <defaults>
</compile_context>

<pallas_src>
import math
from functools import partial

import jax
import jax.numpy as jnp
from jax.experimental import pallas as pl
from jax.experimental.pallas import tpu as pltpu

EPS = 1e-5


def _cdiv(a, b):
    return -(-a // b)


def _lane_tiling(n, seg_len, lane_target=2048, min_steps=2, max_pad_frac=0.25):
    """Pick a batch tile so the packed lane block (b_tile * seg_len) is a
    multiple of 128 (unmasked stores), is close to `lane_target` lanes, gives
    >= `min_steps` grid steps when the batch allows (v7x megacore), and keeps
    batch zero-padding below `max_pad_frac`."""
    per = 128 // math.gcd(seg_len, 128)        # smallest b with (b*L) % 128 == 0
    max_reps = _cdiv(n, per)                   # reps that cover the whole batch
    reps = max(1, min(lane_target // (per * seg_len), max_reps))

    # Prefer >= min_steps grid steps so the "parallel" axis can use both v7x TCs.
    while reps > 1 and _cdiv(max_reps, reps) < min_steps:
        reps -= 1

    # Cap zero-padding waste (padded rows are pure wasted HBM bandwidth).
    def _pad_frac(r):
        b = per * r
        return (_cdiv(n, b) * b - n) / max(n, 1)

    while reps > 1 and _pad_frac(reps) > max_pad_frac:
        reps -= 1

    b_tile = per * reps
    n_pad = _cdiv(n, b_tile) * b_tile
    return b_tile, n_pad


def _bottleneck_kernel(x_ref, w1_ref, b1_ref, w2_ref, b2_ref, w3_ref, b3_ref,
                       o_ref, *, seg_len, compute_dtype):
    x = x_ref[...]                                          # (Cin, LT), compute dtype

    # ---- conv1 (1x1) + folded BN1 + ReLU ----
    h = jnp.dot(w1_ref[...], x, preferred_element_type=jnp.float32)
    h = jnp.maximum(h + b1_ref[...], 0.0)                   # (width, LT) f32

    # ---- conv2 (k=3, stride=1, pad=1) + folded BN2 + ReLU ----
    hc = h.astype(compute_dtype)
    lt = hc.shape[1]
    # Lane position within each packed segment (LT is an exact multiple of seg_len).
    pos = jax.lax.broadcasted_iota(jnp.int32, (1, lt), 1)
    if seg_len & (seg_len - 1) == 0:
        pos = pos & (seg_len - 1)
    else:
        pos = pos % seg_len
    zero = jnp.zeros_like(hc)
    # h_left[l] = h[l-1] (0 at segment start), h_right[l] = h[l+1] (0 at segment end).
    h_left = jnp.where(pos == 0, zero, jnp.roll(hc, 1, axis=1))
    h_right = jnp.where(pos == seg_len - 1, zero, jnp.roll(hc, -1, axis=1))

    w2 = w2_ref[...]                                        # (3, width, width)
    h2 = jnp.dot(w2[0], h_left, preferred_element_type=jnp.float32)
    h2 = h2 + jnp.dot(w2[1], hc, preferred_element_type=jnp.float32)
    h2 = h2 + jnp.dot(w2[2], h_right, preferred_element_type=jnp.float32)
    h2 = jnp.maximum(h2 + b2_ref[...], 0.0)                 # (width, LT) f32

    # ---- conv3 (1x1) + folded BN3 + identity residual + ReLU ----
    h3 = jnp.dot(w3_ref[...], h2.astype(compute_dtype),
                 preferred_element_type=jnp.float32)
    h3 = h3 + b3_ref[...] + x.astype(jnp.float32)
    o_ref[...] = jnp.maximum(h3, 0.0)


def fold_bn(gamma, beta, mean, var):
    scale = (gamma / jnp.sqrt(var + EPS)).astype(jnp.float32)
    bias = (beta - mean * scale).astype(jnp.float32)
    return scale, bias


@partial(jax.jit, static_argnames=("compute_dtype", "lane_target"))
def bottleneck_forward(x, params, compute_dtype=jnp.bfloat16, lane_target=2048):
    """x: (N, Cin, L) float32.  params: conv weights + eval-mode BN params."""
    n, cin, seg_len = x.shape
    w1, w2, w3 = params["w1"], params["w2"], params["w3"]
    cout = w3.shape[0]
    assert cout == cin, "identity residual requires inplanes == planes * expansion"

    # Fold BN scales into the conv weights; pass only per-channel f32 biases.
    s1, b1 = fold_bn(params["g1"], params["be1"], params["m1"], params["v1"])
    s2, b2 = fold_bn(params["g2"], params["be2"], params["m2"], params["v2"])
    s3, b3 = fold_bn(params["g3"], params["be3"], params["m3"], params["v3"])
    w1f = (w1 * s1[:, None]).astype(compute_dtype)                    # (width, Cin)
    # Stacked k=3 weight: w2f[k] multiplies h(l - 1 + k).
    w2f = jnp.transpose(w2 * s2[:, None, None], (2, 0, 1)).astype(compute_dtype)
    w3f = (w3 * s3[:, None]).astype(compute_dtype)                    # (Cout, width)
    b1c, b2c, b3c = b1[:, None], b2[:, None], b3[:, None]             # (C, 1) f32

    # Pack batch onto the lane axis: (N, C, L) -> (C, N_pad*L), in compute dtype
    # (bf16 by default -> half the HBM traffic of the repack + kernel input).
    b_tile, n_pad = _lane_tiling(n, seg_len, lane_target)
    lt = b_tile * seg_len
    if n_pad > n:
        x = jnp.pad(x, ((0, n_pad - n), (0, 0), (0, 0)))
    xp = jnp.transpose(x, (1, 0, 2)).reshape(cin, n_pad * seg_len).astype(compute_dtype)

    grid = (n_pad // b_tile,)

    def fixed(arr):     # whole-array block, constant index map (stays VMEM-resident)
        zeros = (0,) * arr.ndim
        return pl.BlockSpec(arr.shape, lambda i, _z=zeros: _z)

    # Per-step blocks are tiny relative to VMEM (<= Cin/Cout channels x a few
    # thousand lanes), so the default scoped VMEM limit is ample on v5e/v6e/v7x.
    out_packed = pl.pallas_call(
        partial(_bottleneck_kernel, seg_len=seg_len, compute_dtype=compute_dtype),
        out_shape=jax.ShapeDtypeStruct((cout, n_pad * seg_len), jnp.float32),
        grid_spec=pltpu.PrefetchScalarGridSpec(
            num_scalar_prefetch=0,
            grid=grid,
            in_specs=[
                pl.BlockSpec((cin, lt), lambda i: (0, i)),
                fixed(w1f), fixed(b1c),
                fixed(w2f), fixed(b2c),
                fixed(w3f), fixed(b3c),
            ],
            out_specs=pl.BlockSpec((cout, lt), lambda i: (0, i)),
        ),
        compiler_params=pltpu.CompilerParams(
            dimension_semantics=("parallel",)),
    )(xp, w1f, b1c, w2f, b2c, w3f, b3c)

    out = out_packed.reshape(cout, n_pad, seg_len).transpose(1, 0, 2)
    return out[:n]


def reference_forward(x, params):
    """Pure-JAX reference matching the PyTorch Bottleneck (eval-mode BN)."""
    def bn(h, g, b, m, v):
        return (h - m[None, :, None]) / jnp.sqrt(v[None, :, None] + EPS) \
               * g[None, :, None] + b[None, :, None]

    n, cin, seg_len = x.shape
    h = jnp.einsum("oc,ncl->nol", params["w1"], x)
    h = jax.nn.relu(bn(h, params["g1"], params["be1"], params["m1"], params["v1"]))
    hp = jnp.pad(h, ((0, 0), (0, 0), (1, 1)))
    w2 = params["w2"]
    h2 = sum(jnp.einsum("oi,nil->nol", w2[:, :, k], hp[:, :, k:k + seg_len])
             for k in range(3))
    h2 = jax.nn.relu(bn(h2, params["g2"], params["be2"], params["m2"], params["v2"]))
    h3 = jnp.einsum("oc,ncl->nol", params["w3"], h2)
    h3 = bn(h3, params["g3"], params["be3"], params["m3"], params["v3"])
    return jax.nn.relu(h3 + x)


def make_params(key, inplanes, planes, base_width=64, groups=1):
    expansion = 4
    width = int(planes * (base_width / 64.0)) * groups
    cout = planes * expansion
    ks = jax.random.split(key, 16)
    return {
        "w1": jax.random.normal(ks[0], (width, inplanes), jnp.float32) * 0.1,
        "w2": jax.random.normal(ks[1], (width, width, 3), jnp.float32) * 0.1,
        "w3": jax.random.normal(ks[2], (cout, width), jnp.float32) * 0.1,
        "g1": jax.random.uniform(ks[3], (width,), jnp.float32, 0.5, 1.5),
        "be1": jax.random.normal(ks[4], (width,), jnp.float32) * 0.1,
        "m1": jax.random.normal(ks[5], (width,), jnp.float32) * 0.1,
        "v1": jax.random.uniform(ks[6], (width,), jnp.float32, 0.5, 1.5),
        "g2": jax.random.uniform(ks[7], (width,), jnp.float32, 0.5, 1.5),
        "be2": jax.random.normal(ks[8], (width,), jnp.float32) * 0.1,
        "m2": jax.random.normal(ks[9], (width,), jnp.float32) * 0.1,
        "v2": jax.random.uniform(ks[10], (width,), jnp.float32, 0.5, 1.5),
        "g3": jax.random.uniform(ks[11], (cout,), jnp.float32, 0.5, 1.5),
        "be3": jax.random.normal(ks[12], (cout,), jnp.float32) * 0.1,
        "m3": jax.random.normal(ks[13], (cout,), jnp.float32) * 0.1,
        "v3": jax.random.uniform(ks[14], (cout,), jnp.float32, 0.5, 1.5),
    }


if __name__ == "__main__":
    key = jax.random.PRNGKey(0)
    kx, kp = jax.random.split(key)

    # Bottleneck(inplanes=32, planes=8): width=8, output channels=32 -> identity residual.
    n, inplanes, planes, seg_len = 2, 32, 8, 16
    x = jax.random.normal(kx, (n, inplanes, seg_len), jnp.float32)
    params = make_params(kp, inplanes, planes)
    ref = reference_forward(x, params)

    # Default path: bf16 matmul/IO, f32 accumulation + f32 elementwise/residual.
    out = jax.block_until_ready(bottleneck_forward(x, params))
    assert out.shape == (n, planes * 4, seg_len)
    assert jnp.allclose(out, ref, atol=1e-1, rtol=1e-1), "bf16 mismatch vs reference"

    # Exact f32 path, tight tolerance.
    out_f32 = jax.block_until_ready(
        bottleneck_forward(x, params, compute_dtype=jnp.float32))
    assert jnp.allclose(out_f32, ref, atol=1e-4, rtol=1e-4), "f32 mismatch vs reference"

    # Larger batch: exercises batch padding + a multi-step "parallel" grid.
    n2 = 40
    x2 = jax.random.normal(jax.random.PRNGKey(1), (n2, inplanes, seg_len), jnp.float32)
    ref2 = reference_forward(x2, params)
    out2 = jax.block_until_ready(
        bottleneck_forward(x2, params, compute_dtype=jnp.float32))
    assert jnp.allclose(out2, ref2, atol=1e-4, rtol=1e-4), "grid>1 mismatch vs reference"

    print("KERNEL_OK")
</pallas_src>

<mosaic_0001>
module attributes {stable_mosaic.version = 11 : i64} {
  func.func @_bottleneck_kernel(%arg0: i32, %arg1: memref<32x128xbf16, #tpu.memory_space<vmem>>, %arg2: memref<8x32xbf16, #tpu.memory_space<vmem>>, %arg3: memref<8x1xf32, #tpu.memory_space<vmem>>, %arg4: memref<3x8x8xbf16, #tpu.memory_space<vmem>>, %arg5: memref<8x1xf32, #tpu.memory_space<vmem>>, %arg6: memref<32x8xbf16, #tpu.memory_space<vmem>>, %arg7: memref<32x1xf32, #tpu.memory_space<vmem>>, %arg8: memref<32x128xf32, #tpu.memory_space<vmem>>) attributes {dimension_semantics = [#tpu.dimension_semantics<parallel>], iteration_bounds = array<i64: 1>, scalar_prefetch = 0 : i64, scratch_operands = 0 : i64, tpu.core_type = #tpu.core_type<tc>, window_params = [{transform_indices = @transform_0, window_bounds = array<i64: 32, 128>}, {pipeline_mode = #tpu.pipeline_mode<synchronous>, transform_indices = @transform_1, window_bounds = array<i64: 8, 32>}, {pipeline_mode = #tpu.pipeline_mode<synchronous>, transform_indices = @transform_2, window_bounds = array<i64: 8, 1>}, {pipeline_mode = #tpu.pipeline_mode<synchronous>, transform_indices = @transform_3, window_bounds = array<i64: 3, 8, 8>}, {pipeline_mode = #tpu.pipeline_mode<synchronous>, transform_indices = @transform_4, window_bounds = array<i64: 8, 1>}, {pipeline_mode = #tpu.pipeline_mode<synchronous>, transform_indices = @transform_5, window_bounds = array<i64: 32, 8>}, {pipeline_mode = #tpu.pipeline_mode<synchronous>, transform_indices = @transform_6, window_bounds = array<i64: 32, 1>}, {transform_indices = @transform_7, window_bounds = array<i64: 32, 128>}]} {
    %c0 = arith.constant 0 : index
    %c0_0 = arith.constant 0 : index
    %0 = vector.load %arg1[%c0, %c0_0] : memref<32x128xbf16, #tpu.memory_space<vmem>>, vector<32x128xbf16>
    %c0_1 = arith.constant 0 : index
    %c0_2 = arith.constant 0 : index
    %1 = vector.load %arg2[%c0_1, %c0_2] : memref<8x32xbf16, #tpu.memory_space<vmem>>, vector<8x32xbf16>
    %cst = arith.constant dense<0.000000e+00> : vector<8x128xf32>
    %2 = tpu.matmul %1, %0, %cst {dimension_numbers = #tpu.dot_dimension_numbers<[1], [0], [0], [1], [0, 0, 1, 1], [], []>} : vector<8x32xbf16>, vector<32x128xbf16>, vector<8x128xf32> -> vector<8x128xf32>
    %c0_3 = arith.constant 0 : index
    %c0_4 = arith.constant 0 : index
    %3 = vector.load %arg3[%c0_3, %c0_4] : memref<8x1xf32, #tpu.memory_space<vmem>>, vector<8x1xf32>
    %4 = vector.broadcast %3 : vector<8x1xf32> to vector<8x128xf32>
    %5 = arith.addf %2, %4 : vector<8x128xf32>
    %cst_5 = arith.constant 0.000000e+00 : f32
    %6 = vector.broadcast %cst_5 : f32 to vector<8x128xf32>
    %7 = arith.maximumf %5, %6 : vector<8x128xf32>
    %8 = arith.truncf %7 : vector<8x128xf32> to vector<8x128xbf16>
    %9 = tpu.iota {dimensions = array<i32: 1>} : vector<1x128xi32>
    %c15_i32 = arith.constant 15 : i32
    %10 = vector.broadcast %c15_i32 : i32 to vector<1x128xi32>
    %11 = arith.andi %9, %10 : vector<1x128xi32>
    %cst_6 = arith.constant 0.000000e+00 : bf16
    %12 = vector.broadcast %cst_6 : bf16 to vector<8x128xbf16>
    %c0_i32 = arith.constant 0 : i32
    %13 = vector.broadcast %c0_i32 : i32 to vector<1x128xi32>
    %14 = arith.cmpi eq, %11, %13 : vector<1x128xi32>
    %15 = vector.extract_strided_slice %8 {offsets = [0, 127], sizes = [8, 1], strides = [1, 1]} : vector<8x128xbf16> to vector<8x1xbf16>
    %16 = vector.extract_strided_slice %8 {offsets = [0, 0], sizes = [8, 127], strides = [1, 1]} : vector<8x128xbf16> to vector<8x127xbf16>
    %17 = tpu.concatenate %15, %16 in 1 : vector<8x1xbf16>, vector<8x127xbf16> -> vector<8x128xbf16>
    %18 = vector.shape_cast %14 : vector<1x128xi1> to vector<1x128xi1>
    %19 = vector.broadcast %18 : vector<1x128xi1> to vector<8x128xi1>
    %20 = arith.select %19, %12, %17 : vector<8x128xi1>, vector<8x128xbf16>
    %c15_i32_7 = arith.constant 15 : i32
    %21 = vector.broadcast %c15_i32_7 : i32 to vector<1x128xi32>
    %22 = arith.cmpi eq, %11, %21 : vector<1x128xi32>
    %23 = vector.extract_strided_slice %8 {offsets = [0, 1], sizes = [8, 127], strides = [1, 1]} : vector<8x128xbf16> to vector<8x127xbf16>
    %24 = vector.extract_strided_slice %8 {offsets = [0, 0], sizes = [8, 1], strides = [1, 1]} : vector<8x128xbf16> to vector<8x1xbf16>
    %25 = tpu.concatenate %23, %24 in 1 : vector<8x127xbf16>, vector<8x1xbf16> -> vector<8x128xbf16>
    %26 = vector.shape_cast %22 : vector<1x128xi1> to vector<1x128xi1>
    %27 = vector.broadcast %26 : vector<1x128xi1> to vector<8x128xi1>
    %28 = arith.select %27, %12, %25 : vector<8x128xi1>, vector<8x128xbf16>
    %c0_8 = arith.constant 0 : index
    %c0_9 = arith.constant 0 : index
    %c0_10 = arith.constant 0 : index
    %29 = vector.load %arg4[%c0_8, %c0_9, %c0_10] : memref<3x8x8xbf16, #tpu.memory_space<vmem>>, vector<3x8x8xbf16>
    %30 = vector.extract_strided_slice %29 {offsets = [0, 0, 0], sizes = [1, 8, 8], strides = [1, 1, 1]} : vector<3x8x8xbf16> to vector<1x8x8xbf16>
    %31 = vector.shape_cast %30 : vector<1x8x8xbf16> to vector<8x8xbf16>
    %cst_11 = arith.constant dense<0.000000e+00> : vector<8x128xf32>
    %32 = tpu.matmul %31, %20, %cst_11 {dimension_numbers = #tpu.dot_dimension_numbers<[1], [0], [0], [1], [0, 0, 1, 1], [], []>} : vector<8x8xbf16>, vector<8x128xbf16>, vector<8x128xf32> -> vector<8x128xf32>
    %33 = vector.extract_strided_slice %29 {offsets = [1, 0, 0], sizes = [1, 8, 8], strides = [1, 1, 1]} : vector<3x8x8xbf16> to vector<1x8x8xbf16>
    %34 = vector.shape_cast %33 : vector<1x8x8xbf16> to vector<8x8xbf16>
    %cst_12 = arith.constant dense<0.000000e+00> : vector<8x128xf32>
    %35 = tpu.matmul %34, %8, %cst_12 {dimension_numbers = #tpu.dot_dimension_numbers<[1], [0], [0], [1], [0, 0, 1, 1], [], []>} : vector<8x8xbf16>, vector<8x128xbf16>, vector<8x128xf32> -> vector<8x128xf32>
    %36 = arith.addf %32, %35 : vector<8x128xf32>
    %37 = vector.extract_strided_slice %29 {offsets = [2, 0, 0], sizes = [1, 8, 8], strides = [1, 1, 1]} : vector<3x8x8xbf16> to vector<1x8x8xbf16>
    %38 = vector.shape_cast %37 : vector<1x8x8xbf16> to vector<8x8xbf16>
    %cst_13 = arith.constant dense<0.000000e+00> : vector<8x128xf32>
    %39 = tpu.matmul %38, %28, %cst_13 {dimension_numbers = #tpu.dot_dimension_numbers<[1], [0], [0], [1], [0, 0, 1, 1], [], []>} : vector<8x8xbf16>, vector<8x128xbf16>, vector<8x128xf32> -> vector<8x128xf32>
    %40 = arith.addf %36, %39 : vector<8x128xf32>
    %c0_14 = arith.constant 0 : index
    %c0_15 = arith.constant 0 : index
    %41 = vector.load %arg5[%c0_14, %c0_15] : memref<8x1xf32, #tpu.memory_space<vmem>>, vector<8x1xf32>
    %42 = vector.broadcast %41 : vector<8x1xf32> to vector<8x128xf32>
    %43 = arith.addf %40, %42 : vector<8x128xf32>
    %cst_16 = arith.constant 0.000000e+00 : f32
    %44 = vector.broadcast %cst_16 : f32 to vector<8x128xf32>
    %45 = arith.maximumf %43, %44 : vector<8x128xf32>
    %c0_17 = arith.constant 0 : index
    %c0_18 = arith.constant 0 : index
    %46 = vector.load %arg6[%c0_17, %c0_18] : memref<32x8xbf16, #tpu.memory_space<vmem>>, vector<32x8xbf16>
    %47 = arith.truncf %45 : vector<8x128xf32> to vector<8x128xbf16>
    %cst_19 = arith.constant dense<0.000000e+00> : vector<32x128xf32>
    %48 = tpu.matmul %46, %47, %cst_19 {dimension_numbers = #tpu.dot_dimension_numbers<[1], [0], [0], [1], [0, 0, 1, 1], [], []>} : vector<32x8xbf16>, vector<8x128xbf16>, vector<32x128xf32> -> vector<32x128xf32>
    %c0_20 = arith.constant 0 : index
    %c0_21 = arith.constant 0 : index
    %49 = vector.load %arg7[%c0_20, %c0_21] : memref<32x1xf32, #tpu.memory_space<vmem>>, vector<32x1xf32>
    %50 = vector.broadcast %49 : vector<32x1xf32> to vector<32x128xf32>
    %51 = arith.addf %48, %50 : vector<32x128xf32>
    %52 = arith.extf %0 : vector<32x128xbf16> to vector<32x128xf32>
    %53 = arith.addf %51, %52 : vector<32x128xf32>
    %cst_22 = arith.constant 0.000000e+00 : f32
    %54 = vector.broadcast %cst_22 : f32 to vector<32x128xf32>
    %55 = arith.maximumf %53, %54 : vector<32x128xf32>
    %c0_23 = arith.constant 0 : index
    %c0_24 = arith.constant 0 : index
    %56 = vector.load %arg8[%c0_23, %c0_24] : memref<32x128xf32, #tpu.memory_space<vmem>>, vector<32x128xf32>
    tpu.vector_store %arg8[%c0_23, %c0_24], %55 {strides = array<i32>} : memref<32x128xf32, #tpu.memory_space<vmem>>, vector<32x128xf32>,
    return
  }
  func.func @transform_0(%arg0: i32) -> (i32, i32) {
    %c0_i32 = arith.constant 0 : i32
    %c0_i32_0 = arith.constant 0 : i32
    return %c0_i32, %arg0 : i32, i32
  }
  func.func @transform_1(%arg0: i32) -> (i32, i32) {
    %c0_i32 = arith.constant 0 : i32
    %c0_i32_0 = arith.constant 0 : i32
    %c0_i32_1 = arith.constant 0 : i32
    return %c0_i32, %c0_i32_0 : i32, i32
  }
  func.func @transform_2(%arg0: i32) -> (i32, i32) {
    %c0_i32 = arith.constant 0 : i32
    %c0_i32_0 = arith.constant 0 : i32
    %c0_i32_1 = arith.constant 0 : i32
    return %c0_i32, %c0_i32_0 : i32, i32
  }
  func.func @transform_3(%arg0: i32) -> (i32, i32, i32) {
    %c0_i32 = arith.constant 0 : i32
    %c0_i32_0 = arith.constant 0 : i32
    %c0_i32_1 = arith.constant 0 : i32
    %c0_i32_2 = arith.constant 0 : i32
    return %c0_i32, %c0_i32_0, %c0_i32_1 : i32, i32, i32
  }
  func.func @transform_4(%arg0: i32) -> (i32, i32) {
    %c0_i32 = arith.constant 0 : i32
    %c0_i32_0 = arith.constant 0 : i32
    %c0_i32_1 = arith.constant 0 : i32
    return %c0_i32, %c0_i32_0 : i32, i32
  }
  func.func @transform_5(%arg0: i32) -> (i32, i32) {
    %c0_i32 = arith.constant 0 : i32
    %c0_i32_0 = arith.constant 0 : i32
    %c0_i32_1 = arith.constant 0 : i32
    return %c0_i32, %c0_i32_0 : i32, i32
  }
  func.func @transform_6(%arg0: i32) -> (i32, i32) {
    %c0_i32 = arith.constant 0 : i32
    %c0_i32_0 = arith.constant 0 : i32
    %c0_i32_1 = arith.constant 0 : i32
    return %c0_i32, %c0_i32_0 : i32, i32
  }
  func.func @transform_7(%arg0: i32) -> (i32, i32) {
    %c0_i32 = arith.constant 0 : i32
    %c0_i32_0 = arith.constant 0 : i32
    return %c0_i32, %arg0 : i32, i32
  }
}

</mosaic_0001>

<bundles_post_ra>
// kernel: bottleneck_forward.1
= control target key start
LH: loop header
LB: loop body
LE: loop exit
PB: predicated region body
PF: predicated region fallthrough
CT: control target
= control target key end

     0   :  { %v455_v0 = vmov 0.0   ;;  %vm456_vm0 = vmmov 0   ;;  %v457_v3 = vmov 0   ;;  %vm50_vm1 = vcmask 261120   ;;  %s459_s8 = smov 1   ;;  %s578_s0 = inlined_call_operand.vmem [shape: bf16[32,128], index: 0, kind: input, shape index: {}]   ;;  %s579_s2 = inlined_call_operand.vmem [shape: f32[8,1], index: 2, kind: input, shape index: {}]   ;;  %s580_s1 = inlined_call_operand.vmem [shape: bf16[8,32], index: 1, kind: input, shape index: {}]   ;;  %s581_s6 = inlined_call_operand.vmem [shape: f32[32,1], index: 6, kind: input, shape index: {}]   ;;  %s582_s3 = inlined_call_operand.vmem [shape: bf16[3,8,8], index: 3, kind: input, shape index: {}]   ;;  %s583_s4 = inlined_call_operand.vmem [shape: f32[8,1], index: 4, kind: input, shape index: {}]   ;;  %s584_s5 = inlined_call_operand.vmem [shape: bf16[32,8], index: 5, kind: input, shape index: {}]   ;;  %s585_s7 = inlined_call_operand.vmem [shape: f32[32,128], index: 7, kind: output, shape index: {}]  }
   0x1   :  { %409 = vmatprep.subr.bf16.mxu0 %v455_v0  ;;  %v503_v1 = vld [vmem:[%s578_s0] sm:$0xff]   ;;  %v508_v2 = vld [vmem:[%s578_s0 + $0x8] sm:$0xff]   ;;  %413 = vmatprep.mubr.msk.bf16.mxu0 %vm456_vm0, %v455_v0  ;;  %vm125_vm2 = vcmask 1043456   ;;  %vm121_vm3 = vcmask 64512   ;;  %v277_v17 = vld [vmem:[%s581_s6 + $0x10] sm:$0xff]  ;;  %v96_v21 = vlaneseq }
   0x2   :  { %447 = vset.pattern.permute.xlu0 %v457_v3  ;;  %v32_v4 = vld [vmem:[%s579_s2] sm:$0xff]  ;;  %417 = vmatprep.subr.bf16.mxu1 %v455_v0  ;;  %s458_s2 = smov 127   ;;  %v276_v19 = vld [vmem:[%s581_s6 + $0x8] sm:$0xff]  ;;  %v278_v20 = vld [vmem:[%s581_s6 + $0x18] sm:$0xff]  ;;  %v369_v55 = vunpack.c.l.bf16 %v508_v2  ;;  %v367_v56 = vunpack.c.l.bf16 %v503_v1  ;;  %v370_v61 = vunpack.c.h.bf16 %v508_v2  ;;  %v368_v62 = vunpack.c.h.bf16 %v503_v1 }
   0x3   :  { %35 = vperm.xlu0 %447, %v32_v4   ;;  %419 = vmatprep.mubr.msk.bf16.mxu1 %vm456_vm0, %v455_v0  ;;  %v31_v5 = vld [vmem:[%s580_s1] sm:$0xf]  ;;  %v119_v16 = vld [vmem:[%s582_s3 + $0x4] sm:$0xf]  ;;  %v97_v22 = vand.u32 127, %v96_v21  ;;  %v452_v52 = vld [vmem:[%s584_s5 + $0x8] sm:$0xff]  }
   0x4   :  { %410 = vmatpush3.bf16.msra.mxu0 %v503_v1  ;;  %448 = vset.pattern.permute.xlu1 %v457_v3  ;;  %v275_v15 = vld [vmem:[%s581_s6] sm:$0xff]  ;;  %v120_v31 = vld [vmem:[%s582_s3 + $0x8] sm:$0xf] }
   0x5   :  { %411 = vmatprep.subr.bf16.mxu0 %v455_v0  ;;  %v262_v18 = vld [vmem:[%s583_s4] sm:$0xff]  ;;  %v98_v23 = vand.u32 15, %v97_v22 }
   0x6   :  { %v118_v30 = vld [vmem:[%s582_s3] sm:$0xf] }
   0x7   :  { %vm109_vm4 = vcmp.eq.s32.totalorder %v98_v23, 15  ;;  %vm99_vm5 = vcmp.eq.s32.totalorder %v98_v23, 0  ;;  %v451_v33 = vld [vmem:[%s584_s5] sm:$0xff]  }
   0x8   :  { %412 = vmatpush3.bf16.msra.mxu0 %v508_v2  ;;  %vm116_vm6 = vmpackc.low %vm109_vm4, %vm109_vm4 }
   0x9   :  { %429 = vmatprep.subr.bf16.mxu0 %v455_v0  ;;  %vm107_vm7 = vmpackc.low %vm99_vm5, %vm99_vm5 }
   0xb   :  { %414 = vmatmul.mubr.msk.bf16.vlgmr.msra.gmra.mrb[0].mxu0 %vm50_vm1, %v31_v5 }
   0xc   :  { %431 = vmatprep.mubr.msk.bf16.mxu0 %vm456_vm0, %v455_v0 }
  0x82   :  { %v36_v6 = vpop.permute.xlu0 %35 }
  0xde   :  { %v88_v7 = vpop.f32.mrb[0].mxu0 }
  0xdf   :  { %v89_v8 = vadd.f32 %v88_v7, %v36_v6  ;;  %v415_v9 = vpop.f32.mrb[1].mxu0 }
  0xe0   :  { %v91_v10 = vpop.f32.mrb[2].mxu0 }
  0xe1   :  { %v94_v11 = vmax.f32 %v89_v8, 0.0  ;;  %v416_v12 = vpop.f32.mrb[3].mxu0 }
  0xe3   :  { %v95_v13 = vpack.c.bf16 %v94_v11, %v94_v11 }
  0xe5   :  { %110 = vrot.lane.b32.xlu1 %v95_v13, %s458_s2  ;;  %101 = vrot.lane.b32.xlu0 %v95_v13, %s459_s8  ;;  %v127_v14 = vsel %vm125_vm2, %v95_v13, 0 }
  0xe6   :  { %418 = vmatpush3.bf16.msra.mxu1 %v127_v14 }
  0xe7   :  { %423 = vmatprep.subr.bf16.mxu1 %v455_v0 }
  0xe9   :  { %281 = vperm.xlu0 %447, %v275_v15   ;;  %420 = vmatmul.mubr.msk.bf16.vlgmr.msra.gmra.mrb[0].mxu1 %vm121_vm3, %v119_v16 }
  0xea   :  { %425 = vmatprep.mubr.msk.bf16.mxu1 %vm456_vm0, %v455_v0  ;;  %265 = vperm.xlu1 %448, %v262_v18  }
  0xed   :  { %291 = vperm.xlu0 %447, %v277_v17  }
  0xee   :  { %286 = vperm.xlu1 %448, %v276_v19  }
  0xf2   :  { %296 = vperm.xlu1 %448, %v278_v20  }
 0x157   :  { %v111_v24 = vpop.permute.xlu1 %110  ;;  %v102_v25 = vpop.permute.xlu0 %101 }
 0x158   :  { %v117_v26 = vsel %vm116_vm6, 0, %v111_v24  ;;  %v108_v27 = vsel %vm107_vm7, 0, %v102_v25 }
 0x159   :  { %v219_v28 = vsel %vm125_vm2, %v117_v26, 0  ;;  %v173_v29 = vsel %vm125_vm2, %v108_v27, 0 }
 0x15a   :  { %424 = vmatpush3.bf16.msra.mxu1 %v173_v29  ;;  %430 = vmatpush3.bf16.msra.mxu0 %v219_v28 }
 0x15d   :  { %426 = vmatmul.mubr.msk.bf16.vlgmr.msra.gmra.mrb[4].mxu1 %vm121_vm3, %v118_v30  ;;  %432 = vmatmul.mubr.msk.bf16.vlgmr.msra.gmra.mrb[4].mxu0 %vm121_vm3, %v120_v31 }
 0x15e   :  { %437 = vmatprep.mubr.msk.bf16.mxu1 %vm121_vm3, %v451_v33 }
 0x168   :  { %v282_v53 = vpop.permute.xlu0 %281 }
 0x169   :  { %v266_v47 = vpop.permute.xlu1 %265 }
 0x16c   :  { %v292_v57 = vpop.permute.xlu0 %291 }
 0x16d   :  { %v287_v54 = vpop.permute.xlu1 %286 }
 0x171   :  { %v297_v63 = vpop.permute.xlu1 %296 }
 0x1bc   :  { %v163_v32 = vpop.f32.mrb[0].mxu1 }
 0x1bd   :  { %v421_v34 = vpop.f32.mrb[1].mxu1 }
 0x1be   :  { %v166_v35 = vpop.f32.mrb[2].mxu1 }
 0x1bf   :  { %v422_v36 = vpop.f32.mrb[3].mxu1 }
 0x230   :  { %v209_v37 = vpop.f32.mrb[4].mxu1  ;;  %v255_v38 = vpop.f32.mrb[4].mxu0 }
 0x231   :  { %v210_v39 = vadd.f32 %v209_v37, %v163_v32  ;;  %v427_v40 = vpop.f32.mrb[5].mxu1  ;;  %v433_v41 = vpop.f32.mrb[5].mxu0 }
 0x232   :  { %v212_v42 = vpop.f32.mrb[6].mxu1  ;;  %v258_v43 = vpop.f32.mrb[6].mxu0 }
 0x233   :  { %v261_v44 = vadd.f32 %v255_v38, %v210_v39  ;;  %v428_v45 = vpop.f32.mrb[7].mxu1  ;;  %v434_v46 = vpop.f32.mrb[7].mxu0 }
 0x235   :  { %v268_v48 = vadd.f32 %v266_v47, %v261_v44 }
 0x237   :  { %v269_v49 = vmax.f32 %v268_v48, 0.0 }
 0x239   :  { %v274_v50 = vpack.c.bf16 %v269_v49, %v269_v49 }
 0x23b   :  { %441 = vmatprep.subr.msk.bf16.mxu1 %vm125_vm2, %v274_v50  ;;  %v316_v51 = vsel %vm125_vm2, %v274_v50, 0 }
 0x23c   :  { %436 = vmatpush3.bf16.msra.mxu1 %v316_v51 }
 0x23f   :  { %438 = vmatmul.mubr.msk.bf16.vlgmr.msra.gmra.mrb[8].mxu1 %vm121_vm3, %v452_v52 }
 0x312   :  { %v439_v58 = vpop.f32.mrb[8].mxu1 }
 0x313   :  { %v361_v59 = vadd.f32 %v439_v58, %v292_v57  ;;  %v352_v60 = vpop.f32.mrb[9].mxu1 }
 0x314   :  { %v353_v0 = vadd.f32 %v352_v60, %v282_v53  ;;  %v440_v3 = vpop.f32.mrb[10].mxu1 }
 0x315   :  { %v373_v4 = vadd.f32 %v369_v55, %v361_v59  ;;  %v364_v5 = vadd.f32 %v440_v3, %v297_v63  ;;  %v355_v6 = vpop.f32.mrb[11].mxu1 }
 0x316   :  { %v371_v7 = vadd.f32 %v367_v56, %v353_v0  ;;  %v356_v8 = vadd.f32 %v355_v6, %v287_v54 }
 0x317   :  { %v377_v9 = vmax.f32 %v373_v4, 0.0  ;;  %v374_v10 = vadd.f32 %v370_v61, %v364_v5 }
 0x318   :  { %v375_v11 = vmax.f32 %v371_v7, 0.0  ;;  %v372_v12 = vadd.f32 %v368_v62, %v356_v8 }
 0x319   :  { %381 = vst [vmem:[%s585_s7 + $0x10] sm:$0xff] %v377_v9  ;;  %v378_v13 = vmax.f32 %v374_v10, 0.0 }
 0x31a   :  { %379 = vst [vmem:[%s585_s7] sm:$0xff] %v375_v11  ;;  %v376_v1 = vmax.f32 %v372_v12, 0.0 }
 0x31b   :  { %382 = vst [vmem:[%s585_s7 + $0x18] sm:$0xff] %v378_v13 }
 0x31c   :  { %380 = vst [vmem:[%s585_s7 + $0x8] sm:$0xff] %v376_v1 }

</bundles_post_ra>
